<compile_context>
chip_gen: v7x
topology: tpu7x:2x2x1
jax: 0.10.0
libtpu: 0.0.40
codegen_flags: <defaults>
</compile_context>

<pallas_src>
import functools

import jax
import jax.numpy as jnp
from jax.experimental import pallas as pl
from jax.experimental.pallas import tpu as pltpu


def _critic_kernel(s_ref, a_ref, w1s_ref, w1a_ref, b1_ref, w2_ref, b2_ref,
                   w3_ref, b3_ref, o_ref, *, compute_dtype):
    # Layer 1: split matmul replaces concat([s, a]) @ W1.T.
    s = s_ref[...].astype(compute_dtype)
    a = a_ref[...].astype(compute_dtype)
    h1 = jnp.dot(s, w1s_ref[...], preferred_element_type=jnp.float32)
    h1 = h1 + jnp.dot(a, w1a_ref[...], preferred_element_type=jnp.float32)
    h1 = jnp.maximum(h1 + b1_ref[...], 0.0)                       # (TB, H), f32 VPU path

    # Layer 2.
    h2 = jnp.dot(h1.astype(compute_dtype), w2_ref[...],
                 preferred_element_type=jnp.float32)
    h2 = jnp.maximum(h2 + b2_ref[...], 0.0)                       # (TB, H)

    # Layer 3 (H -> 1): VPU broadcast-multiply + lane reduction instead of a
    # 1-wide MXU matmul.
    y = jnp.sum(h2 * w3_ref[...], axis=-1, keepdims=True) + b3_ref[...]
    o_ref[...] = y.astype(o_ref.dtype)                            # (TB, 1)


def critic_forward(state, action, params, *, block_b=128,
                   compute_dtype=jnp.float32):
    """Pallas wrapper. state: (B, S), action: (B, A); returns (B, 1)."""
    w1, b1, w2, b2, w3, b3 = params                # PyTorch nn.Linear shapes
    B, S = state.shape
    A = action.shape[1]
    H = w1.shape[0]

    # One-time layout plumbing at the XLA level (outside the kernel):
    #   - pre-transpose to (in, out) so the kernel never transposes,
    #   - split W1 so the kernel never concatenates,
    #   - cast matmul weights to the compute dtype (bf16 on v6e/v7x).
    w1s = w1[:, :S].T.astype(compute_dtype)        # (S, H)
    w1a = w1[:, S:].T.astype(compute_dtype)        # (A, H)
    w2t = w2.T.astype(compute_dtype)               # (H, H)
    w3r = w3.reshape(1, H).astype(jnp.float32)     # (1, H), used on the VPU in f32
    b1r = b1.reshape(1, H).astype(jnp.float32)
    b2r = b2.reshape(1, H).astype(jnp.float32)
    b3r = b3.reshape(1, 1).astype(jnp.float32)

    tb = min(block_b, B)                           # batch tile (>=128 when B allows)
    grid = (pl.cdiv(B, tb),)

    # Weights/biases stay VMEM-resident across batch tiles.
    resident = lambda shape: pl.BlockSpec(shape, lambda i: (0, 0))

    itemsize = jnp.dtype(compute_dtype).itemsize
    cost = pl.CostEstimate(
        flops=2 * B * ((S + A) * H + H * H + H),
        transcendentals=0,
        bytes_accessed=(B * (S + A) * state.dtype.itemsize        # activations in
                        + B * 1 * 4                               # output
                        + ((S + A) * H + H * H) * itemsize        # matmul weights
                        + (3 * H + 1) * 4),                       # biases + w3 row
    )

    kernel = functools.partial(_critic_kernel, compute_dtype=compute_dtype)

    return pl.pallas_call(
        kernel,
        out_shape=jax.ShapeDtypeStruct((B, 1), jnp.float32),
        grid=grid,
        in_specs=[
            pl.BlockSpec((tb, S), lambda i: (i, 0)),   # state tile
            pl.BlockSpec((tb, A), lambda i: (i, 0)),   # action tile
            resident((S, H)),                          # W1 (state part)
            resident((A, H)),                          # W1 (action part)
            resident((1, H)),                          # b1
            resident((H, H)),                          # W2
            resident((1, H)),                          # b2
            resident((1, H)),                          # w3 row
            resident((1, 1)),                          # b3
        ],
        out_specs=pl.BlockSpec((tb, 1), lambda i: (i, 0)),
        compiler_params=pltpu.CompilerParams(
            dimension_semantics=("parallel",),         # v7x: shard batch over 2 TCs
        ),
        cost_estimate=cost,
    )(state, action, w1s, w1a, b1r, w2t, b2r, w3r, b3r)


def init_params(key, input_size, hidden_size):
    """Deterministic synthetic init matching nn.Linear shapes (out, in)."""
    ks = jax.random.split(key, 6)

    def uniform(k, shape, fan_in):
        bound = 1.0 / jnp.sqrt(fan_in)
        return jax.random.uniform(k, shape, jnp.float32, -bound, bound)

    w1 = uniform(ks[0], (hidden_size, input_size), input_size)
    b1 = uniform(ks[1], (hidden_size,), input_size)
    w2 = uniform(ks[2], (hidden_size, hidden_size), hidden_size)
    b2 = uniform(ks[3], (hidden_size,), hidden_size)
    w3 = uniform(ks[4], (1, hidden_size), hidden_size)
    b3 = uniform(ks[5], (1,), hidden_size)
    return (w1, b1, w2, b2, w3, b3)


def critic_ref(state, action, params):
    """Pure-JAX reference for validation (PyTorch semantics)."""
    w1, b1, w2, b2, w3, b3 = params
    x = jnp.concatenate([state, action], axis=1)
    h1 = jnp.maximum(x @ w1.T + b1, 0.0)
    h2 = jnp.maximum(h1 @ w2.T + b2, 0.0)
    return h2 @ w3.T + b3


if __name__ == "__main__":
    # Small, forward-consistent shapes: state_dim + action_dim == linear1 in_features.
    # TODO(synk): hidden=32 wastes 96/128 lanes per vreg; pad hidden to 128 if the
    # surrounding model allows it.
    batch, state_dim, action_dim, hidden = 8, 12, 4, 32
    input_size = state_dim + action_dim

    key = jax.random.PRNGKey(0)
    k_s, k_a, k_p = jax.random.split(key, 3)
    state = jax.random.normal(k_s, (batch, state_dim), jnp.float32)
    action = jax.random.normal(k_a, (batch, action_dim), jnp.float32)
    params = init_params(k_p, input_size, hidden)

    ref = critic_ref(state, action, params)

    # f32 matmul-operand path (exact match to reference).
    out = jax.block_until_ready(critic_forward(state, action, params))
    assert out.shape == (batch, 1)
    assert jnp.allclose(out, ref, atol=1e-5, rtol=1e-5)

    # bf16 matmul-operand path (v6e/v7x MXU peak), f32 accumulation + f32 VPU path.
    out_bf16 = jax.block_until_ready(
        critic_forward(state, action, params, compute_dtype=jnp.bfloat16))
    assert out_bf16.shape == (batch, 1)
    assert jnp.allclose(out_bf16, ref, atol=5e-2, rtol=5e-2)

    print("KERNEL_OK")
</pallas_src>

<mosaic_0001>
module attributes {stable_mosaic.version = 11 : i64} {
  func.func @_critic_kernel(%arg0: i32, %arg1: memref<8x12xf32, #tpu.memory_space<vmem>>, %arg2: memref<8x4xf32, #tpu.memory_space<vmem>>, %arg3: memref<12x32xf32, #tpu.memory_space<vmem>>, %arg4: memref<4x32xf32, #tpu.memory_space<vmem>>, %arg5: memref<1x32xf32, #tpu.memory_space<vmem>>, %arg6: memref<32x32xf32, #tpu.memory_space<vmem>>, %arg7: memref<1x32xf32, #tpu.memory_space<vmem>>, %arg8: memref<1x32xf32, #tpu.memory_space<vmem>>, %arg9: memref<1x1xf32, #tpu.memory_space<vmem>>, %arg10: memref<8x1xf32, #tpu.memory_space<vmem>>) attributes {dimension_semantics = [#tpu.dimension_semantics<parallel>], iteration_bounds = array<i64: 1>, scalar_prefetch = 0 : i64, scratch_operands = 0 : i64, tpu.core_type = #tpu.core_type<tc>, window_params = [{transform_indices = @transform_0, window_bounds = array<i64: 8, 12>}, {transform_indices = @transform_1, window_bounds = array<i64: 8, 4>}, {pipeline_mode = #tpu.pipeline_mode<synchronous>, transform_indices = @transform_2, window_bounds = array<i64: 12, 32>}, {pipeline_mode = #tpu.pipeline_mode<synchronous>, transform_indices = @transform_3, window_bounds = array<i64: 4, 32>}, {pipeline_mode = #tpu.pipeline_mode<synchronous>, transform_indices = @transform_4, window_bounds = array<i64: 1, 32>}, {pipeline_mode = #tpu.pipeline_mode<synchronous>, transform_indices = @transform_5, window_bounds = array<i64: 32, 32>}, {pipeline_mode = #tpu.pipeline_mode<synchronous>, transform_indices = @transform_6, window_bounds = array<i64: 1, 32>}, {pipeline_mode = #tpu.pipeline_mode<synchronous>, transform_indices = @transform_7, window_bounds = array<i64: 1, 32>}, {pipeline_mode = #tpu.pipeline_mode<synchronous>, transform_indices = @transform_8, window_bounds = array<i64: 1, 1>}, {transform_indices = @transform_9, window_bounds = array<i64: 8, 1>}]} {
    %c0 = arith.constant 0 : index
    %c0_0 = arith.constant 0 : index
    %0 = vector.load %arg1[%c0, %c0_0] : memref<8x12xf32, #tpu.memory_space<vmem>>, vector<8x12xf32>
    %c0_1 = arith.constant 0 : index
    %c0_2 = arith.constant 0 : index
    %1 = vector.load %arg2[%c0_1, %c0_2] : memref<8x4xf32, #tpu.memory_space<vmem>>, vector<8x4xf32>
    %c0_3 = arith.constant 0 : index
    %c0_4 = arith.constant 0 : index
    %2 = vector.load %arg3[%c0_3, %c0_4] : memref<12x32xf32, #tpu.memory_space<vmem>>, vector<12x32xf32>
    %cst = arith.constant dense<0.000000e+00> : vector<8x32xf32>
    %3 = tpu.matmul %0, %2, %cst {dimension_numbers = #tpu.dot_dimension_numbers<[1], [0], [0], [1], [0, 0, 1, 1], [], []>} : vector<8x12xf32>, vector<12x32xf32>, vector<8x32xf32> -> vector<8x32xf32>
    %c0_5 = arith.constant 0 : index
    %c0_6 = arith.constant 0 : index
    %4 = vector.load %arg4[%c0_5, %c0_6] : memref<4x32xf32, #tpu.memory_space<vmem>>, vector<4x32xf32>
    %cst_7 = arith.constant dense<0.000000e+00> : vector<8x32xf32>
    %5 = tpu.matmul %1, %4, %cst_7 {dimension_numbers = #tpu.dot_dimension_numbers<[1], [0], [0], [1], [0, 0, 1, 1], [], []>} : vector<8x4xf32>, vector<4x32xf32>, vector<8x32xf32> -> vector<8x32xf32>
    %6 = arith.addf %3, %5 : vector<8x32xf32>
    %c0_8 = arith.constant 0 : index
    %c0_9 = arith.constant 0 : index
    %7 = vector.load %arg5[%c0_8, %c0_9] : memref<1x32xf32, #tpu.memory_space<vmem>>, vector<1x32xf32>
    %8 = vector.broadcast %7 : vector<1x32xf32> to vector<8x32xf32>
    %9 = arith.addf %6, %8 : vector<8x32xf32>
    %cst_10 = arith.constant 0.000000e+00 : f32
    %10 = vector.broadcast %cst_10 : f32 to vector<8x32xf32>
    %11 = arith.maximumf %9, %10 : vector<8x32xf32>
    %c0_11 = arith.constant 0 : index
    %c0_12 = arith.constant 0 : index
    %12 = vector.load %arg6[%c0_11, %c0_12] : memref<32x32xf32, #tpu.memory_space<vmem>>, vector<32x32xf32>
    %cst_13 = arith.constant dense<0.000000e+00> : vector<8x32xf32>
    %13 = tpu.matmul %11, %12, %cst_13 {dimension_numbers = #tpu.dot_dimension_numbers<[1], [0], [0], [1], [0, 0, 1, 1], [], []>} : vector<8x32xf32>, vector<32x32xf32>, vector<8x32xf32> -> vector<8x32xf32>
    %c0_14 = arith.constant 0 : index
    %c0_15 = arith.constant 0 : index
    %14 = vector.load %arg7[%c0_14, %c0_15] : memref<1x32xf32, #tpu.memory_space<vmem>>, vector<1x32xf32>
    %15 = vector.broadcast %14 : vector<1x32xf32> to vector<8x32xf32>
    %16 = arith.addf %13, %15 : vector<8x32xf32>
    %cst_16 = arith.constant 0.000000e+00 : f32
    %17 = vector.broadcast %cst_16 : f32 to vector<8x32xf32>
    %18 = arith.maximumf %16, %17 : vector<8x32xf32>
    %c0_17 = arith.constant 0 : index
    %c0_18 = arith.constant 0 : index
    %19 = vector.load %arg8[%c0_17, %c0_18] : memref<1x32xf32, #tpu.memory_space<vmem>>, vector<1x32xf32>
    %20 = vector.broadcast %19 : vector<1x32xf32> to vector<8x32xf32>
    %21 = arith.mulf %18, %20 : vector<8x32xf32>
    %cst_19 = arith.constant dense<0.000000e+00> : vector<8xf32>
    %22 = vector.multi_reduction <add>, %21, %cst_19 [1] : vector<8x32xf32> to vector<8xf32>
    %23 = vector.shape_cast %22 : vector<8xf32> to vector<8x1xf32>
    %c0_20 = arith.constant 0 : index
    %c0_21 = arith.constant 0 : index
    %24 = vector.load %arg9[%c0_20, %c0_21] : memref<1x1xf32, #tpu.memory_space<vmem>>, vector<1x1xf32>
    %25 = vector.broadcast %24 : vector<1x1xf32> to vector<8x1xf32>
    %26 = arith.addf %23, %25 : vector<8x1xf32>
    %c0_22 = arith.constant 0 : index
    %c0_23 = arith.constant 0 : index
    %27 = vector.load %arg10[%c0_22, %c0_23] : memref<8x1xf32, #tpu.memory_space<vmem>>, vector<8x1xf32>
    tpu.vector_store %arg10[%c0_22, %c0_23], %26 {strides = array<i32>} : memref<8x1xf32, #tpu.memory_space<vmem>>, vector<8x1xf32>,
    return
  }
  func.func @transform_0(%arg0: i32) -> (i32, i32) {
    %c0_i32 = arith.constant 0 : i32
    %c0_i32_0 = arith.constant 0 : i32
    return %arg0, %c0_i32 : i32, i32
  }
  func.func @transform_1(%arg0: i32) -> (i32, i32) {
    %c0_i32 = arith.constant 0 : i32
    %c0_i32_0 = arith.constant 0 : i32
    return %arg0, %c0_i32 : i32, i32
  }
  func.func @transform_2(%arg0: i32) -> (i32, i32) {
    %c0_i32 = arith.constant 0 : i32
    %c0_i32_0 = arith.constant 0 : i32
    %c0_i32_1 = arith.constant 0 : i32
    return %c0_i32, %c0_i32_0 : i32, i32
  }
  func.func @transform_3(%arg0: i32) -> (i32, i32) {
    %c0_i32 = arith.constant 0 : i32
    %c0_i32_0 = arith.constant 0 : i32
    %c0_i32_1 = arith.constant 0 : i32
    return %c0_i32, %c0_i32_0 : i32, i32
  }
  func.func @transform_4(%arg0: i32) -> (i32, i32) {
    %c0_i32 = arith.constant 0 : i32
    %c0_i32_0 = arith.constant 0 : i32
    %c0_i32_1 = arith.constant 0 : i32
    return %c0_i32, %c0_i32_0 : i32, i32
  }
  func.func @transform_5(%arg0: i32) -> (i32, i32) {
    %c0_i32 = arith.constant 0 : i32
    %c0_i32_0 = arith.constant 0 : i32
    %c0_i32_1 = arith.constant 0 : i32
    return %c0_i32, %c0_i32_0 : i32, i32
  }
  func.func @transform_6(%arg0: i32) -> (i32, i32) {
    %c0_i32 = arith.constant 0 : i32
    %c0_i32_0 = arith.constant 0 : i32
    %c0_i32_1 = arith.constant 0 : i32
    return %c0_i32, %c0_i32_0 : i32, i32
  }
  func.func @transform_7(%arg0: i32) -> (i32, i32) {
    %c0_i32 = arith.constant 0 : i32
    %c0_i32_0 = arith.constant 0 : i32
    %c0_i32_1 = arith.constant 0 : i32
    return %c0_i32, %c0_i32_0 : i32, i32
  }
  func.func @transform_8(%arg0: i32) -> (i32, i32) {
    %c0_i32 = arith.constant 0 : i32
    %c0_i32_0 = arith.constant 0 : i32
    %c0_i32_1 = arith.constant 0 : i32
    return %c0_i32, %c0_i32_0 : i32, i32
  }
  func.func @transform_9(%arg0: i32) -> (i32, i32) {
    %c0_i32 = arith.constant 0 : i32
    %c0_i32_0 = arith.constant 0 : i32
    return %arg0, %c0_i32 : i32, i32
  }
}

</mosaic_0001>

<bundles_post_ra>
// kernel: tpu_custom_call.1
= control target key start
LH: loop header
LB: loop body
LE: loop exit
PB: predicated region body
PF: predicated region fallthrough
CT: control target
= control target key end

     0   :  { %s612_s0 = inlined_call_operand.hbm [shape: f32[8,12], index: 0, kind: input, shape index: {}]   ;;  %s613_s1 = inlined_call_operand.vmem [shape: f32[8,4], index: 1, kind: input, shape index: {}]   ;;  %s614_s2 = inlined_call_operand.hbm [shape: f32[12,32], index: 2, kind: input, shape index: {}]   ;;  %s615_s3 = inlined_call_operand.hbm [shape: f32[4,32], index: 3, kind: input, shape index: {}]   ;;  %s616_s4 = inlined_call_operand.vmem [shape: f32[1,32], index: 4, kind: input, shape index: {}]   ;;  %s617_s5 = inlined_call_operand.vmem [shape: f32[32,32], index: 5, kind: input, shape index: {}]   ;;  %s618_s6 = inlined_call_operand.vmem [shape: f32[1,32], index: 6, kind: input, shape index: {}]   ;;  %s619_s7 = inlined_call_operand.vmem [shape: f32[1,32], index: 7, kind: input, shape index: {}]   ;;  %s620_s8 = inlined_call_operand.<no memory space> [shape: f32[1,1], index: 8, kind: input, shape index: {}]   ;;  %s621_s9 = inlined_call_operand.vmem [shape: f32[8,1], index: 9, kind: output, shape index: {}]  }
   0x1   :  { %v14_v0 = vstv %s620_s8 }
   0x2   :  { %15 = vst [vmem:[#allocation2] sm:$0x1] %v14_v0 }
   0x3   :  { %16 = vsyncpa [#allocation4], 0 }
   0x4   :  { %17 = vsyncpa [#allocation6], 0  ;;  %s484_s11 = smov [#allocation5]   ;;  %s414_s15 = scalar_lea.hbm %s614_s2, 256 }
   0x5   :  { %s35_s12 = sshll.u32 %s484_s11, 4  ;;  %p415_p0 = scmp.ne.s32.totalorder %s614_s2, %s414_s15  ;;  %s36_s12 = int_to_ptr.vmem [resolvable:$true] %s35_s12 }
   0x6   :  { %p418_p1 = scmp.lt.u32.totalorder %s414_s15, %s614_s2 }
   0x8   :  { %p420_p2 = pnand %p418_p1, %p415_p0 }
   0xa   :  { %423 = shalt.err (!%p420_p2)
}
   0xb   :  { %s424_s8 = scalar_lea.vmem %s36_s12, 256  ;;  %p429_p4 = scmp.lt.s32.totalorder %s36_s12, %s36_s12 }
   0xc   :  { %p425_p3 = scmp.ne.s32.totalorder %s36_s12, %s424_s8  ;;  %p430_p5 = scmp.lt.s32.totalorder %s424_s8, %s424_s8 }
   0xe   :  { %p431_p6 = por %p430_p5, %p429_p4 }
  0x10   :  { %p432_p7 = pnand %p431_p6, %p425_p3 }
  0x12   :  { %435 = shalt.err (!%p432_p7)
}
  0x13   :  { %s485_s20 = smov 128   ;;  %s486_s21 = smov 8  }
  0x14   :  { %41 = dma.hbm_to_vmem [thread:$0]  %s614_s2, 256, %s36_s12, [#allocation6], %s485_s20, %s485_s20, %s486_s21  }
  0x15   :  { %s487_s24 = smov [#allocation3]   ;;  %s488_s26 = smov [#allocation7]  }
  0x16   :  { %s24_s25 = sshll.u32 %s487_s24, 4  ;;  %s48_s27 = sshll.u32 %s488_s26, 4  ;;  %s25_s25 = int_to_ptr.vmem [resolvable:$true] %s24_s25  ;;  %s49_s27 = int_to_ptr.vmem [resolvable:$true] %s48_s27 }
  0x17   :  { %s436_s30 = scalar_lea.hbm %s612_s0, 128 }
  0x18   :  { %p437_p8 = scmp.ne.s32.totalorder %s612_s0, %s436_s30  ;;  %p440_p9 = scmp.lt.u32.totalorder %s436_s30, %s612_s0 }
  0x1a   :  { %p442_p10 = pnand %p440_p9, %p437_p8 }
  0x1c   :  { %445 = shalt.err (!%p442_p10)
}
  0x1d   :  { %s446_s2 = scalar_lea.vmem %s25_s25, 128  ;;  %p451_p12 = scmp.lt.s32.totalorder %s25_s25, %s25_s25 }
  0x1e   :  { %p447_p11 = scmp.ne.s32.totalorder %s25_s25, %s446_s2  ;;  %p452_p13 = scmp.lt.s32.totalorder %s446_s2, %s446_s2 }
  0x20   :  { %p453_p0 = por %p452_p13, %p451_p12 }
  0x22   :  { %p454_p1 = pnand %p453_p0, %p447_p11 }
  0x24   :  { %457 = shalt.err (!%p454_p1)
}
  0x25   :  { %27 = dma.hbm_to_vmem [thread:$0]  %s612_s0, 128, %s25_s25, [#allocation4]  }
  0x26   :  { %s458_s18 = scalar_lea.hbm %s615_s3, 64 }
  0x27   :  { %p459_p2 = scmp.ne.s32.totalorder %s615_s3, %s458_s18  ;;  %p462_p3 = scmp.lt.u32.totalorder %s458_s18, %s615_s3 }
  0x29   :  { %p464_p4 = pnand %p462_p3, %p459_p2 }
  0x2b   :  { %467 = shalt.err (!%p464_p4)
}
  0x2c   :  { %s468_s22 = scalar_lea.vmem %s49_s27, 64  ;;  %p473_p6 = scmp.lt.s32.totalorder %s49_s27, %s49_s27 }
  0x2d   :  { %p469_p5 = scmp.ne.s32.totalorder %s49_s27, %s468_s22  ;;  %p474_p7 = scmp.lt.s32.totalorder %s468_s22, %s468_s22 }
  0x2f   :  { %p475_p8 = por %p474_p7, %p473_p6 }
  0x31   :  { %p476_p9 = pnand %p475_p8, %p469_p5 }
  0x33   :  { %479 = shalt.err (!%p476_p9)
}
  0x34   :  { %51 = dma.hbm_to_vmem [thread:$0]  %s615_s3, 64, %s49_s27, [#allocation6]  }
  0x35   :  { %480 = dma.done.wait [#allocation4], 128  }
  0x36   :  { %481 = vsyncadd [#allocation4], 4294967168 }
  0x37   :  { %482 = dma.done.wait [#allocation6], 320  }
  0x38   :  { %483 = vsyncadd [#allocation6], 4294966976  ;;  %v489_v1 = vmov 0.0   ;;  %vm490_vm0 = vmmov 0   ;;  %v491_v2 = vmov 0.0|0.0   ;;  %vm80_vm1 = vcmask 1043456  }
  0x39   :  { %372 = vmatprep.subr.mxu1 %v489_v1  ;;  %374 = vmatprep.mubr.msk.f32.mxu1 %vm490_vm0, %v489_v1  ;;  %vm76_vm2 = vcmask 31744   ;;  %v75_v3 = vld [vmem:[#allocation7] sm:$0xf]  ;;  %v72_v4 = vld [vmem:[%s613_s1] sm:$0xff]  ;;  %v73_v5 = vld [vmem:[#allocation5] sm:$0xff]  ;;  %vm492_vm3 = vmmov 1  }
  0x3a   :  { %399 = vmatprep.subr.bf16.mxu0 %v491_v2  ;;  %392 = vmatprep.mubr.msk.f32.mxu0 %vm490_vm0, %v489_v1  ;;  %vm397_vm4 = vmpackc.low %vm80_vm1, %vm492_vm3  ;;  %v74_v6 = vld [vmem:[#allocation5 + $0x8] sm:$0xf]  ;;  %v71_v8 = vld [vmem:[#allocation3] sm:$0xff]  ;;  %vm154_vm5 = vcmask 97280   ;;  %vm251_vm6 = vcmask 261120   ;;  %vm345_vm7 = vcmask 7168  }
  0x3b   :  { %373 = vmatpush3.msk.msra.mxu1 %vm80_vm1, %v75_v3  ;;  %v396_v7 = vpack.c.bf16 %v74_v6, %v73_v5  ;;  %v240_v9 = vld [vmem:[%s617_s5] sm:$0xff]  ;;  %v241_v10 = vld [vmem:[%s617_s5 + $0x8] sm:$0xff]  ;;  %v242_v12 = vld [vmem:[%s617_s5 + $0x10] sm:$0xff] }
  0x3c   :  { %375 = vmatmul.mubr.msk.f32.vlgmr.msra.gmra.mrb[0].mxu1 %vm76_vm2, %v72_v4  ;;  %395 = vmatprep.subr.bf16.mxu1 %v491_v2  ;;  %v400_v11 = vpack.c.bf16 %v241_v10, %v240_v9  ;;  %v243_v13 = vld [vmem:[%s617_s5 + $0x18] sm:$0xff]  ;;  %v357_v18 = vld [vmem:[%s616_s4] ss:$0 sm:$0xff] }
  0x3d   :  { %381 = vmatprep.mubr.msk.f32.mxu1 %vm490_vm0, %v489_v1  ;;  %398 = vmatpush3.bf16.msk.msra.mxu1 %vm397_vm4, %v396_v7  ;;  %v403_v14 = vpack.c.bf16 %v243_v13, %v242_v12  ;;  %v358_v23 = vld [vmem:[%s618_s6] ss:$0 sm:$0xff] }
  0x3e   :  { %401 = vmatpush3.bf16.msra.mxu0 %v400_v11  ;;  %v360_v27 = vld [vmem:[%s619_s7] ss:$0 sm:$0xff] }
  0x3f   :  { %402 = vmatprep.subr.bf16.mxu0 %v491_v2  ;;  %v361_v31 = vld [vmem:[#allocation2] ss:$0 sm:$0xff] }
  0x40   :  { %382 = vmatmul.mubr.msk.f32.vlgmr.msra.gmra.mrb[2].mxu1 %vm154_vm5, %v71_v8 }
  0x42   :  { %404 = vmatpush3.bf16.msra.mxu0 %v403_v14 }
 0x10f   :  { %v150_v15 = vpop.f32.mrb[0].mxu1 }
 0x110   :  { %v376_v16 = vpop.f32.mrb[1].mxu1 }
 0x113   :  { %v227_v17 = vpop.f32.mrb[2].mxu1 }
 0x114   :  { %v228_v19 = vadd.f32 %v227_v17, %v150_v15  ;;  %v383_v20 = vpop.f32.mrb[3].mxu1 }
 0x116   :  { %v238_v21 = vadd.f32 %v357_v18, %v228_v19 }
 0x118   :  { %v239_v22 = vmax.f32 %v238_v21, 0.0 }
 0x11a   :  { %393 = vmatmul.mubr.msk.f32.vlgmr.msra.gmra.mrb[0].mxu0 %vm251_vm6, %v239_v22 }
 0x1ed   :  { %v321_v24 = vpop.f32.mrb[0].mxu0 }
 0x1ee   :  { %v322_v25 = vadd.f32 %v358_v23, %v321_v24  ;;  %v394_v26 = vpop.f32.mrb[1].mxu0 }
 0x1f0   :  { %v325_v28 = vmax.f32 %v322_v25, 0.0 }
 0x1f2   :  { %v333_v29 = vmul.f32 %v360_v27, %v325_v28 }
 0x1f4   :  { %v334_v30 = vsel %vm251_vm6, %v333_v29, 0.0 }
 0x1f5   :  { %335 = vadd.xlane.f32.xlu0 %v334_v30 }
 0x282   :  { %v336_v32 = vpop.xlane.xlu0 %335 }
 0x283   :  { %v344_v33 = vadd.f32 %v361_v31, %v336_v32 }
 0x285   :  { %346 = vst.msk [vmem:[%s621_s9] sm:$0xff] %vm345_vm7, %v344_v33 }
 0x286   :  { %351 = vsyncpa [#allocation4], 1 }
 0x287   :  { %352 = vsyncpa [#allocation6], 1 }

</bundles_post_ra>
